<compile_context>
chip_gen: v6e
topology: v6e:2x2x1
jax: 0.10.0
libtpu: 0.0.40
codegen_flags: <defaults>
</compile_context>

<pallas_src>
import functools

import jax
import jax.numpy as jnp
from jax import lax
from jax.experimental import pallas as pl
from jax.experimental.pallas import tpu as pltpu


def _ce_rows(logits_f32, tgt_idx, col, smooth):
    """Per-row label-smoothed CE without materializing log-probs.

    logits_f32: (TB, C) f32, tgt_idx: (TB, 1) int32, col: (TB, C) int32 iota.
      smooth == 0: loss_i = lse_i - logits_i[t_i]
      smooth  > 0: loss_i = lse_i - sum_c w_c * logits_i[c],
                   w_c = smooth/C + (c == t_i) * (1 - smooth)
    (single fused weighted reduction instead of two separate passes).
    """
    C = logits_f32.shape[1]
    m = jnp.max(logits_f32, axis=1, keepdims=True)
    lse = jnp.log(jnp.sum(jnp.exp(logits_f32 - m), axis=1, keepdims=True)) + m
    if smooth == 0.0:
        tgt_logit = jnp.sum(jnp.where(col == tgt_idx, logits_f32, 0.0),
                            axis=1, keepdims=True)
        return lse - tgt_logit
    w = jnp.where(col == tgt_idx,
                  jnp.float32(1.0 - smooth + smooth / C),
                  jnp.float32(smooth / C))
    weighted = jnp.sum(w * logits_f32, axis=1, keepdims=True)
    return lse - weighted  # (TB, 1)


def hard_distillation_kernel(pred_ref, pred_for_t_ref, pred_of_t_ref, gt_ref,
                             out_ref, *, alpha, smooth, total_b, needs_mask):
    pred = pred_ref[...].astype(jnp.float32)       # (TB, C) student logits vs gt
    pft = pred_for_t_ref[...].astype(jnp.float32)  # (TB, C) distill-head logits
    pot = pred_of_t_ref[...]                       # (TB, C) teacher logits (native dtype)
    gt = gt_ref[...]                               # (TB, 1) int32

    TB, C = pred.shape
    col = lax.broadcasted_iota(jnp.int32, (TB, C), 1)

    # Teacher hard labels: first maximal index (comparisons in native dtype).
    t_max = jnp.max(pot, axis=1, keepdims=True)
    idx_or_big = jnp.where(pot == t_max, col, jnp.int32(C))
    t_idx = jnp.min(idx_or_big, axis=1, keepdims=True)           # (TB, 1)

    s_ps = _ce_rows(pred, gt, col, smooth)                        # (TB, 1)
    t_ps = _ce_rows(pft, t_idx, col, smooth)                      # (TB, 1)
    blended = (1.0 - alpha) * s_ps + alpha * t_ps                 # (TB, 1)

    if needs_mask:
        i = pl.program_id(0)
        last = pl.num_programs(0) - 1

        @pl.when(i != last)
        def _():
            out_ref[...] = blended

        @pl.when(i == last)
        def _():
            # Select (not multiply) so NaN/inf from padded garbage rows in the
            # tail tile never contaminates the result.
            row = i * TB + lax.broadcasted_iota(jnp.int32, (TB, 1), 0)
            out_ref[...] = jnp.where(row < total_b, blended, 0.0)
    else:
        out_ref[...] = blended


def _round_down8(x):
    return max(8, (x // 8) * 8)


def _choose_tile_b(B, C, itemsize, target_block_bytes):
    """Bytes-based tile: each input block ~target_block_bytes, >=2 grid blocks
    when the batch allows it (v7x megacore), multiple of 8 unless full batch."""
    fit = target_block_bytes // max(1, C * itemsize)
    tile_b = max(8, min(B, int(fit)))
    if B >= 16:
        # Ensure at least two grid blocks so the "parallel" batch axis can
        # shard across v7x's two TensorCores.
        half_round_up8 = -(-(-(-B // 2)) // 8) * 8
        tile_b = min(tile_b, half_round_up8)
    if tile_b < B:
        tile_b = _round_down8(tile_b)
    return min(tile_b, B)


def hard_distillation(pred, pred_for_t, pred_of_t, gt, *, alpha=0.5,
                      smooth=0.0, tile_b=None, target_block_bytes=2 << 20,
                      cast_inputs_to_bf16=False):
    """Pallas implementation of HardDistillation.forward. Returns a scalar f32."""
    if cast_inputs_to_bf16:
        # Numerics-visible: halves HBM traffic (kernel is bandwidth-bound) but
        # reduces logit precision. Off by default.
        pred = pred.astype(jnp.bfloat16)
        pred_for_t = pred_for_t.astype(jnp.bfloat16)
        pred_of_t = pred_of_t.astype(jnp.bfloat16)

    B, C = pred.shape
    gt2d = gt.astype(jnp.int32).reshape(B, 1)
    itemsize = jnp.dtype(pred.dtype).itemsize

    if tile_b is None:
        tile_b = _choose_tile_b(B, C, itemsize, target_block_bytes)
    else:
        tile_b = min(int(tile_b), B)
        if tile_b < B:
            tile_b = _round_down8(tile_b)

    num_blocks = pl.cdiv(B, tile_b)
    needs_mask = (B % tile_b) != 0

    # Scoped-VMEM budget: 3 inputs x 2 pipeline buffers + ~6 tile-sized f32
    # temporaries (upcasts, exp, iota, weights) + tiny (tile_b, 1) slabs.
    block_in_bytes = tile_b * C * itemsize
    f32_tmp_bytes = tile_b * C * 4
    vmem_est = 6 * block_in_bytes + 6 * f32_tmp_bytes + 64 * tile_b
    vmem_limit = int(vmem_est * 1.25) + (1 << 20)
    vmem_limit = max(vmem_limit, 16 << 20)
    vmem_limit = min(vmem_limit, 60 << 20)   # stay under v7x 64 MiB physical

    kernel = functools.partial(hard_distillation_kernel,
                               alpha=float(alpha), smooth=float(smooth),
                               total_b=B, needs_mask=needs_mask)

    cost = pl.CostEstimate(
        flops=14 * B * C,
        transcendentals=2 * B * C,
        bytes_accessed=3 * B * C * itemsize + 8 * B,
    )

    per_sample = pl.pallas_call(
        kernel,
        out_shape=jax.ShapeDtypeStruct((B, 1), jnp.float32),
        grid=(num_blocks,),
        in_specs=[
            pl.BlockSpec((tile_b, C), lambda i: (i, 0)),
            pl.BlockSpec((tile_b, C), lambda i: (i, 0)),
            pl.BlockSpec((tile_b, C), lambda i: (i, 0)),
            pl.BlockSpec((tile_b, 1), lambda i: (i, 0)),
        ],
        out_specs=pl.BlockSpec((tile_b, 1), lambda i: (i, 0)),
        compiler_params=pltpu.CompilerParams(
            dimension_semantics=("parallel",),
            vmem_limit_bytes=vmem_limit),
        cost_estimate=cost,
    )(pred, pred_for_t, pred_of_t, gt2d)

    return jnp.sum(per_sample) / B


def _reference(pred, pred_for_t, pred_of_t, gt, alpha, smooth):
    """Plain-JAX reference matching F.cross_entropy(label_smoothing=smooth)."""
    def ce(logits, labels):
        C = logits.shape[1]
        logp = jax.nn.log_softmax(logits.astype(jnp.float32), axis=1)
        onehot = jax.nn.one_hot(labels, C, dtype=jnp.float32)
        q = (1.0 - smooth) * onehot + smooth / C
        return jnp.mean(-jnp.sum(q * logp, axis=1))
    s = ce(pred, gt)
    t = ce(pred_for_t, jnp.argmax(pred_of_t, axis=1))
    return (1.0 - alpha) * s + alpha * t


if __name__ == "__main__":
    B, C = 20, 128            # non-multiple-of-tile batch to exercise tail masking
    alpha = 0.5

    key = jax.random.PRNGKey(0)
    k1, k2, k3, k4 = jax.random.split(key, 4)
    pred = jax.random.normal(k1, (B, C), dtype=jnp.float32)
    pred_for_t = jax.random.normal(k2, (B, C), dtype=jnp.float32)
    pred_of_t = jax.random.normal(k3, (B, C), dtype=jnp.float32)
    gt = jax.random.randint(k4, (B,), 0, C, dtype=jnp.int32)

    for smooth in (0.0, 0.1):   # exercise both the fast path and the fused path
        ref = _reference(pred, pred_for_t, pred_of_t, gt, alpha, smooth)

        # Auto tile (>= 2 blocks for B=20 -> tile_b=16, masked tail block).
        out_auto = hard_distillation(pred, pred_for_t, pred_of_t, gt,
                                     alpha=alpha, smooth=smooth)
        out_auto = jax.block_until_ready(out_auto)
        assert jnp.allclose(out_auto, ref, rtol=1e-5, atol=1e-5), (smooth, out_auto, ref)

        # Explicit small tile (grid=(3,), tail tile with 4 valid rows).
        out_tiled = hard_distillation(pred, pred_for_t, pred_of_t, gt,
                                      alpha=alpha, smooth=smooth, tile_b=8)
        out_tiled = jax.block_until_ready(out_tiled)
        assert jnp.allclose(out_tiled, ref, rtol=1e-5, atol=1e-5), (smooth, out_tiled, ref)

        # Full-batch single block (no masking path).
        out_full = hard_distillation(pred, pred_for_t, pred_of_t, gt,
                                     alpha=alpha, smooth=smooth, tile_b=B)
        out_full = jax.block_until_ready(out_full)
        assert jnp.allclose(out_full, ref, rtol=1e-5, atol=1e-5), (smooth, out_full, ref)

    print("KERNEL_OK")
</pallas_src>

<mosaic_0001>
module attributes {stable_mosaic.version = 11 : i64} {
  func.func @hard_distillation_kernel(%arg0: i32, %arg1: memref<16x128xf32, #tpu.memory_space<vmem>>, %arg2: memref<16x128xf32, #tpu.memory_space<vmem>>, %arg3: memref<16x128xf32, #tpu.memory_space<vmem>>, %arg4: memref<16x1xi32, #tpu.memory_space<vmem>>, %arg5: memref<16x1xf32, #tpu.memory_space<vmem>>) attributes {dimension_semantics = [#tpu.dimension_semantics<parallel>], iteration_bounds = array<i64: 2>, scalar_prefetch = 0 : i64, scratch_operands = 0 : i64, tpu.core_type = #tpu.core_type<tc>, window_params = [{transform_indices = @transform_0, window_bounds = array<i64: 16, 128>}, {transform_indices = @transform_1, window_bounds = array<i64: 16, 128>}, {transform_indices = @transform_2, window_bounds = array<i64: 16, 128>}, {transform_indices = @transform_3, window_bounds = array<i64: 16, 1>}, {transform_indices = @transform_4, window_bounds = array<i64: 16, 1>}]} {
    %c0 = arith.constant 0 : index
    %c0_0 = arith.constant 0 : index
    %0 = vector.load %arg1[%c0, %c0_0] : memref<16x128xf32, #tpu.memory_space<vmem>>, vector<16x128xf32>
    %c0_1 = arith.constant 0 : index
    %c0_2 = arith.constant 0 : index
    %1 = vector.load %arg2[%c0_1, %c0_2] : memref<16x128xf32, #tpu.memory_space<vmem>>, vector<16x128xf32>
    %c0_3 = arith.constant 0 : index
    %c0_4 = arith.constant 0 : index
    %2 = vector.load %arg3[%c0_3, %c0_4] : memref<16x128xf32, #tpu.memory_space<vmem>>, vector<16x128xf32>
    %c0_5 = arith.constant 0 : index
    %c0_6 = arith.constant 0 : index
    %3 = vector.load %arg4[%c0_5, %c0_6] : memref<16x1xi32, #tpu.memory_space<vmem>>, vector<16x1xi32>
    %4 = tpu.iota {dimensions = array<i32: 1>} : vector<16x128xi32>
    %cst = arith.constant dense<0xFF800000> : vector<16xf32>
    %5 = vector.multi_reduction <maximumf>, %2, %cst [1] : vector<16x128xf32> to vector<16xf32>
    %6 = vector.shape_cast %5 : vector<16xf32> to vector<16x1xf32>
    %7 = vector.broadcast %6 : vector<16x1xf32> to vector<16x128xf32>
    %8 = arith.cmpf oeq, %2, %7 : vector<16x128xf32>
    %c128_i32 = arith.constant 128 : i32
    %9 = vector.broadcast %c128_i32 : i32 to vector<16x128xi32>
    %10 = arith.select %8, %4, %9 : vector<16x128xi1>, vector<16x128xi32>
    %cst_7 = arith.constant dense<2147483647> : vector<16xi32>
    %11 = vector.multi_reduction <minsi>, %10, %cst_7 [1] : vector<16x128xi32> to vector<16xi32>
    %12 = vector.shape_cast %11 : vector<16xi32> to vector<16x1xi32>
    %cst_8 = arith.constant dense<0xFF800000> : vector<16xf32>
    %13 = vector.multi_reduction <maximumf>, %0, %cst_8 [1] : vector<16x128xf32> to vector<16xf32>
    %14 = vector.shape_cast %13 : vector<16xf32> to vector<16x1xf32>
    %15 = vector.broadcast %14 : vector<16x1xf32> to vector<16x128xf32>
    %16 = arith.subf %0, %15 : vector<16x128xf32>
    %17 = math.exp %16 : vector<16x128xf32>
    %cst_9 = arith.constant dense<0.000000e+00> : vector<16xf32>
    %18 = vector.multi_reduction <add>, %17, %cst_9 [1] : vector<16x128xf32> to vector<16xf32>
    %19 = vector.shape_cast %18 : vector<16xf32> to vector<16x1xf32>
    %20 = math.log %19 : vector<16x1xf32>
    %21 = arith.addf %20, %14 : vector<16x1xf32>
    %22 = vector.broadcast %3 : vector<16x1xi32> to vector<16x128xi32>
    %23 = arith.cmpi eq, %4, %22 : vector<16x128xi32>
    %cst_10 = arith.constant 0.000000e+00 : f32
    %24 = vector.broadcast %cst_10 : f32 to vector<16x128xf32>
    %25 = arith.select %23, %0, %24 : vector<16x128xi1>, vector<16x128xf32>
    %cst_11 = arith.constant dense<0.000000e+00> : vector<16xf32>
    %26 = vector.multi_reduction <add>, %25, %cst_11 [1] : vector<16x128xf32> to vector<16xf32>
    %27 = vector.shape_cast %26 : vector<16xf32> to vector<16x1xf32>
    %28 = arith.subf %21, %27 : vector<16x1xf32>
    %cst_12 = arith.constant dense<0xFF800000> : vector<16xf32>
    %29 = vector.multi_reduction <maximumf>, %1, %cst_12 [1] : vector<16x128xf32> to vector<16xf32>
    %30 = vector.shape_cast %29 : vector<16xf32> to vector<16x1xf32>
    %31 = vector.broadcast %30 : vector<16x1xf32> to vector<16x128xf32>
    %32 = arith.subf %1, %31 : vector<16x128xf32>
    %33 = math.exp %32 : vector<16x128xf32>
    %cst_13 = arith.constant dense<0.000000e+00> : vector<16xf32>
    %34 = vector.multi_reduction <add>, %33, %cst_13 [1] : vector<16x128xf32> to vector<16xf32>
    %35 = vector.shape_cast %34 : vector<16xf32> to vector<16x1xf32>
    %36 = math.log %35 : vector<16x1xf32>
    %37 = arith.addf %36, %30 : vector<16x1xf32>
    %38 = vector.broadcast %12 : vector<16x1xi32> to vector<16x128xi32>
    %39 = arith.cmpi eq, %4, %38 : vector<16x128xi32>
    %cst_14 = arith.constant 0.000000e+00 : f32
    %40 = vector.broadcast %cst_14 : f32 to vector<16x128xf32>
    %41 = arith.select %39, %1, %40 : vector<16x128xi1>, vector<16x128xf32>
    %cst_15 = arith.constant dense<0.000000e+00> : vector<16xf32>
    %42 = vector.multi_reduction <add>, %41, %cst_15 [1] : vector<16x128xf32> to vector<16xf32>
    %43 = vector.shape_cast %42 : vector<16xf32> to vector<16x1xf32>
    %44 = arith.subf %37, %43 : vector<16x1xf32>
    %cst_16 = arith.constant 5.000000e-01 : f32
    %45 = vector.broadcast %cst_16 : f32 to vector<16x1xf32>
    %46 = arith.mulf %45, %28 : vector<16x1xf32>
    %cst_17 = arith.constant 5.000000e-01 : f32
    %47 = vector.broadcast %cst_17 : f32 to vector<16x1xf32>
    %48 = arith.mulf %47, %44 : vector<16x1xf32>
    %49 = arith.addf %46, %48 : vector<16x1xf32>
    %c1_i32 = arith.constant 1 : i32
    %50 = arith.cmpi ne, %arg0, %c1_i32 : i32
    %51 = arith.extui %50 : i1 to i32
    %c0_i32 = arith.constant 0 : i32
    %52 = arith.cmpi ne, %51, %c0_i32 : i32
    scf.if %52 {
      %c0_20 = arith.constant 0 : index
      %c0_21 = arith.constant 0 : index
      %56 = vector.load %arg5[%c0_20, %c0_21] : memref<16x1xf32, #tpu.memory_space<vmem>>, vector<16x1xf32>
      tpu.vector_store %arg5[%c0_20, %c0_21], %49 {strides = array<i32>} : memref<16x1xf32, #tpu.memory_space<vmem>>, vector<16x1xf32>,
    } else {
    }
    %c1_i32_18 = arith.constant 1 : i32
    %53 = arith.cmpi eq, %arg0, %c1_i32_18 : i32
    %54 = arith.extui %53 : i1 to i32
    %c0_i32_19 = arith.constant 0 : i32
    %55 = arith.cmpi ne, %54, %c0_i32_19 : i32
    scf.if %55 {
      %c16_i32 = arith.constant 16 : i32
      %56 = arith.muli %arg0, %c16_i32 : i32
      %57 = tpu.iota {dimensions = array<i32: 0>} : vector<16x1xi32>
      %58 = vector.broadcast %56 : i32 to vector<16x1xi32>
      %59 = arith.addi %58, %57 : vector<16x1xi32>
      %c20_i32 = arith.constant 20 : i32
      %60 = vector.broadcast %c20_i32 : i32 to vector<16x1xi32>
      %61 = arith.cmpi slt, %59, %60 : vector<16x1xi32>
      %cst_20 = arith.constant 0.000000e+00 : f32
      %62 = vector.broadcast %cst_20 : f32 to vector<16x1xf32>
      %63 = arith.select %61, %49, %62 : vector<16x1xi1>, vector<16x1xf32>
      %c0_21 = arith.constant 0 : index
      %c0_22 = arith.constant 0 : index
      %64 = vector.load %arg5[%c0_21, %c0_22] : memref<16x1xf32, #tpu.memory_space<vmem>>, vector<16x1xf32>
      tpu.vector_store %arg5[%c0_21, %c0_22], %63 {strides = array<i32>} : memref<16x1xf32, #tpu.memory_space<vmem>>, vector<16x1xf32>,
    } else {
    }
    return
  }
  func.func @transform_0(%arg0: i32) -> (i32, i32) {
    %c0_i32 = arith.constant 0 : i32
    %c0_i32_0 = arith.constant 0 : i32
    return %arg0, %c0_i32 : i32, i32
  }
  func.func @transform_1(%arg0: i32) -> (i32, i32) {
    %c0_i32 = arith.constant 0 : i32
    %c0_i32_0 = arith.constant 0 : i32
    return %arg0, %c0_i32 : i32, i32
  }
  func.func @transform_2(%arg0: i32) -> (i32, i32) {
    %c0_i32 = arith.constant 0 : i32
    %c0_i32_0 = arith.constant 0 : i32
    return %arg0, %c0_i32 : i32, i32
  }
  func.func @transform_3(%arg0: i32) -> (i32, i32) {
    %c0_i32 = arith.constant 0 : i32
    %c0_i32_0 = arith.constant 0 : i32
    return %arg0, %c0_i32 : i32, i32
  }
  func.func @transform_4(%arg0: i32) -> (i32, i32) {
    %c0_i32 = arith.constant 0 : i32
    %c0_i32_0 = arith.constant 0 : i32
    return %arg0, %c0_i32 : i32, i32
  }
}

</mosaic_0001>

<bundles_post_ra>
// kernel: tpu_custom_call.1
= control target key start
LH: loop header
LB: loop body
LE: loop exit
PB: predicated region body
PF: predicated region fallthrough
CT: control target
= control target key end

     0   :  { %9 = vsyncpa [#allocation3], 0  ;;  %s1413_s0 = inlined_call_operand.vmem [shape: f32[20,128], index: 0, kind: input, shape index: {}]   ;;  %s1414_s1 = inlined_call_operand.hbm [shape: f32[20,128], index: 1, kind: input, shape index: {}]   ;;  %s1415_s2 = inlined_call_operand.hbm [shape: f32[20,128], index: 2, kind: input, shape index: {}]   ;;  %s1416_s3 = inlined_call_operand.vmem [shape: s32[20,1], index: 3, kind: input, shape index: {}]   ;;  %s1417_s4 = inlined_call_operand.vmem [shape: f32[20,1], index: 4, kind: output, shape index: {}]  }
   0x1   :  { %11 = vsyncpa [#allocation3 + $0x1], 0 }
   0x2   :  { %12 = vsyncpa [#allocation5], 0 }
   0x3   :  { %14 = vsyncpa [#allocation5 + $0x1], 0  ;;  %s1143_s15 = smov 0   ;;  %s1145_s16 = smov 0  }
   0x4   :  { %s1147_s17 = smov 0   ;;  %s1149_s18 = smov 0  }
   0x5 LB: > { %s1162_s19 = sadd.s32 4294967295, %s1077_s18   ;;  %s1165_s20 = sadd.s32 1, %s1077_s18   ;;  %s1077_s18 = sphi %s1149_s18, %s1427_s18   ;;  %s1073_s17 = sphi %s1147_s17, %s1426_s17   ;;  %s1069_s16 = sphi %s1145_s16, %s1425_s16   ;;  %s1065_s15 = sphi %s1143_s15, %s1424_s15  }
   0x6   : > { %s50_s21 = ssub.s32 %s1077_s18, %s1165_s20  ;;  %s53_s22 = sadd.s32 1, %s1073_s17 }
   0x7   : > { %p51_p0 = scmp.eq.s32.totalorder %s50_s21, 0  ;;  %p60_p1 = scmp.ne.s32.totalorder %s1073_s17, %s1069_s16 }
   0x8   : > { %p61_p2 = scmp.eq.s32.totalorder %s1077_s18, 0  ;;  %p66_p3 = scmp.ne.s32.totalorder %s1069_s16, %s1065_s15 }
   0x9   : > { %s1175_s23 = scalar_select %p51_p0, %s1073_s17, %s53_s22  }
   0xa   : > { %p1177_p4 = por %p61_p2, %p60_p1  ;;  %p67_p5 = scmp.eq.s32.totalorder %s1162_s19, 0 }
   0xb   : > { %p1418_p6 = scmp.eq.s32.totalorder %s1162_s19, 1  ;;  %p786_p9 = scmp.ge.s32.totalorder %s1077_s18, 2 }
   0xc   : > { %p1183_p7 = por %p67_p5, %p66_p3 }
   0xd   : > { %p1189_p8 = por %p1418_p6, %p60_p1  ;;  %164 = sbr.rel (%p786_p9) target bundleno = 82 (0x52), region = 16 }
   0xf   : > { %s1421_s26 = scalar_select %p1189_p8, 1, 0 }
  0x12   : > { %184 = sbr.rel (!%p1177_p4) target bundleno = 50 (0x32), region = 24  ;;  %s185_s27 = sand.u32 (%p1177_p4), 1, %s1073_s17  }
  0x13   : > { %s788_s28 = sshll.u32 (%p1177_p4), %s1077_s18, 1  ;;  %s787_s29 = sshll.u32 (%p1177_p4), %s185_s27, 4 }
  0x14   : > { %s191_s30 = ssub.s32 (%p1177_p4), 3, %s788_s28  ;;  %s1201_s7 = scalar_lea.sflag (%p1177_p4), [#allocation3], %s185_s27 }
  0x15   : > { %p192_p10 = scmp.lt.s32.totalorder (%p1177_p4), %s191_s30, 2  ;;  %s189_s8 = scalar_lea.vmem (%p1177_p4), [#allocation2], %s787_s29 }
  0x17   : > { %s1429_s30 = smov (!%p192_p10, %s191_s30), 2 }
  0x18   : > { %s1198_s5 = sshll.u32 %s1429_s30, 7 }
  0x19   : > { %s196_s6 = ssub.s32 256, %s1198_s5 }
  0x1a   : > { %197 = vsyncadd %s1201_s7, %s196_s6  ;;  %p790_p11 = scmp.ne.s32.totalorder %s1198_s5, 0  ;;  %s829_s9 = sshll.u32 %s1077_s18, 8 }
  0x1b   : > { %s1209_s12 = scalar_lea.hbm %s1414_s1, %s829_s9  ;;  %s202_s13 = sshll.u32 %s189_s8, 4  ;;  %s1211_s13 = int_to_ptr.vmem [resolvable:$true] %s202_s13 }
  0x1c   : > { %s955_s14 = scalar_lea.hbm %s1209_s12, %s1198_s5  ;;  %s959_s22 = scalar_lea.hbm %s1414_s1, 384 }
  0x1d   : > { %p956_p12 = scmp.ne.s32.totalorder %s1209_s12, %s955_s14  ;;  %p960_p1 = scmp.lt.s32.totalorder %s1209_s12, %s1414_s1 }
  0x1e   : > { %p961_p2 = scmp.lt.s32.totalorder %s959_s22, %s955_s14 }
  0x1f   : > { %p957_p13 = pnand %p956_p12, %p790_p11 }
  0x20   : > { %p962_p3 = por %p961_p2, %p960_p1 }
  0x21   : > { %p958_p0 = pneg %p957_p13 }
  0x23   : > { %p963_p5 = pnand %p962_p3, %p958_p0 }
  0x25   : > { %966 = shalt.err (!%p963_p5)
}
  0x26   : > { %s967_s29 = scalar_lea.vmem %s1211_s13, %s1198_s5  ;;  %s1111_s30 = smov [#allocation2]  }
  0x27   : > { %p968_p9 = scmp.ne.s32.totalorder %s1211_s13, %s967_s29  ;;  %s971_s6 = sshll.u32 %s1111_s30, 4  ;;  %s972_s6 = int_to_ptr.vmem [resolvable:$false] %s971_s6 }
  0x28   : > { %s973_s8 = scalar_lea.vmem %s972_s6, 512  ;;  %p974_p13 = scmp.lt.s32.totalorder %s1211_s13, %s972_s6 }
  0x29   : > { %p969_p10 = pnand %p968_p9, %p790_p11  ;;  %p975_p6 = scmp.lt.s32.totalorder %s973_s8, %s967_s29 }
  0x2b   : > { %p970_p12 = pneg %p969_p10  ;;  %p976_p8 = por %p975_p6, %p974_p13 }
  0x2d   : > { %p977_p1 = pnand %p976_p8, %p970_p12 }
  0x2f   : > { %980 = shalt.err (!%p977_p1)
}
  0x30   : > { %s1112_s9 = smov 128   ;;  %s1113_s10 = smov 8  }
  0x31   : > { %208 = dma.hbm_to_vmem [thread:$0]  (%p790_p11), %s1209_s12, %s1198_s5, %s1211_s13, %s1201_s7, %s1112_s9, %s1112_s9, %s1113_s10  }
  0x32 PF: > { %211 = sbr.rel (!%p1177_p4) target bundleno = 82 (0x52), region = 28  ;;  %s212_s11 = sand.u32 (%p1177_p4), 1, %s1073_s17  }
  0x33   : > { %s795_s14 = sshll.u32 (%p1177_p4), %s1077_s18, 1  ;;  %s794_s15 = sshll.u32 (%p1177_p4), %s212_s11, 4 }
  0x34   : > { %s218_s21 = ssub.s32 (%p1177_p4), 3, %s795_s14  ;;  %s1244_s28 = scalar_lea.sflag (%p1177_p4), [#allocation5], %s212_s11 }
  0x35   : > { %p219_p6 = scmp.lt.s32.totalorder (%p1177_p4), %s218_s21, 2  ;;  %s216_s5 = scalar_lea.vmem (%p1177_p4), [#allocation4], %s794_s15 }
  0x37   : > { %s1431_s21 = smov (!%p219_p6, %s218_s21), 2 }
  0x38   : > { %s1241_s22 = sshll.u32 %s1431_s21, 7 }
  0x39   : > { %s223_s27 = ssub.s32 256, %s1241_s22 }
  0x3a   : > { %224 = vsyncadd %s1244_s28, %s223_s27  ;;  %p797_p4 = scmp.ne.s32.totalorder %s1241_s22, 0  ;;  %s830_s24 = sshll.u32 %s1077_s18, 8 }
  0x3b   : > { %s1252_s13 = scalar_lea.hbm %s1415_s2, %s830_s24  ;;  %s229_s29 = sshll.u32 %s216_s5, 4  ;;  %s1254_s29 = int_to_ptr.vmem [resolvable:$true] %s229_s29 }
  0x3c   : > { %s981_s30 = scalar_lea.hbm %s1252_s13, %s1241_s22  ;;  %s985_s9 = scalar_lea.hbm %s1415_s2, 384 }
  0x3d   : > { %p982_p8 = scmp.ne.s32.totalorder %s1252_s13, %s981_s30  ;;  %p986_p2 = scmp.lt.s32.totalorder %s1252_s13, %s1415_s2 }
  0x3e   : > { %p987_p3 = scmp.lt.s32.totalorder %s985_s9, %s981_s30 }
  0x3f   : > { %p983_p11 = pnand %p982_p8, %p797_p4 }
  0x40   : > { %p988_p5 = por %p987_p3, %p986_p2 }
  0x41   : > { %p984_p0 = pneg %p983_p11 }
  0x43   : > { %p989_p9 = pnand %p988_p5, %p984_p0 }
  0x45   : > { %992 = shalt.err (!%p989_p9)
}
  0x46   : > { %s993_s14 = scalar_lea.vmem %s1254_s29, %s1241_s22  ;;  %s1114_s15 = smov [#allocation4]  }
  0x47   : > { %p994_p10 = scmp.ne.s32.totalorder %s1254_s29, %s993_s14  ;;  %s997_s21 = sshll.u32 %s1114_s15, 4  ;;  %s998_s21 = int_to_ptr.vmem [resolvable:$false] %s997_s21 }
  0x48   : > { %s999_s27 = scalar_lea.vmem %s998_s21, 512  ;;  %p1000_p1 = scmp.lt.s32.totalorder %s1254_s29, %s998_s21 }
  0x49   : > { %p995_p12 = pnand %p994_p10, %p797_p4  ;;  %p1001_p6 = scmp.lt.s32.totalorder %s999_s27, %s993_s14 }
  0x4b   : > { %p996_p13 = pneg %p995_p12  ;;  %p1002_p8 = por %p1001_p6, %p1000_p1 }
  0x4d   : > { %p1003_p11 = pnand %p1002_p8, %p996_p13 }
  0x4f   : > { %1006 = shalt.err (!%p1003_p11)
}
  0x50   : > { %s1115_s5 = smov 128   ;;  %s1116_s24 = smov 8  }
  0x51   : > { %235 = dma.hbm_to_vmem [thread:$0]  (%p797_p4), %s1252_s13, %s1241_s22, %s1254_s29, %s1244_s28, %s1115_s5, %s1115_s5, %s1116_s24  }
  0x52 PF: > { %p801_p0 = scmp.ge.s32.totalorder %s1077_s18, 1  ;;  %p254_p2 = scmp.lt.s32.totalorder %s1077_s18, 3 }
  0x54   : > { %p255_p3 = pnand %p801_p0, %p254_p2 }
  0x55   : > { %s260_s7 = sand.u32 (!%p255_p3), 1, %s1069_s16  }
  0x56   : > { %258 = sbr.rel (%p255_p3) target bundleno = 746 (0x2ea), region = 36  ;;  %s1283_s12 = sshll.u32 (!%p255_p3), %s260_s7, 4 }
  0x57   : > { %s261_s30 = scalar_lea.sflag (!%p255_p3), [#allocation3], %s260_s7  ;;  %s264_s6 = scalar_lea.vmem (!%p255_p3), [#allocation2], %s1283_s12 }
  0x5b   : > { %1056 = dma.done.wait (%p1183_p7), %s261_s30, 256  }
  0x5c   : > { %1058 = vsyncadd (%p1183_p7), %s261_s30, 4294967040  ;;  %s270_s22 = scalar_lea.sflag [#allocation5], %s260_s7  ;;  %s273_s28 = scalar_lea.vmem [#allocation4], %s1283_s12 }
  0x5d   : > { %1060 = dma.done.wait (%p1183_p7), %s270_s22, 256  }
  0x5e   : > { %1062 = vsyncadd (%p1183_p7), %s270_s22, 4294967040  ;;  %v367_v0 = vld [vmem:[%s273_s28] sm:$0xff]  ;;  %v368_v1 = vld [vmem:[%s273_s28 + $0x8] sm:$0xff]  ;;  %s1296_s18 = sshll.u32 %s1162_s19, 1  ;;  %v371_v4 = vlaneseq  ;;  %v1117_v16 = vmov 0   ;;  %s1358_s15 = scalar_lea.vmem [#allocation6], %s1283_s12  }
  0x5f   : > { %373 = vmax.xlane.f32.xlu0 %v367_v0  ;;  %p325_p4 = scmp.lt.s32.totalorder %s1296_s18, 2  ;;  %v1313_v3 = vld [vmem:[%s264_s6] sm:$0xff]  ;;  %v1323_v15 = vld [vmem:[%s264_s6 + $0x8] sm:$0xff]  ;;  %938 = vset.pattern.permute.xlu1 %v1117_v16  ;;  %p1422_p7 = scmp.eq.s32.totalorder %s1162_s19, 1 }
  0x60   : > { %v1317_v5 = vand.u32 127, %v371_v4  ;;  %937 = vset.pattern.permute.xlu0 %v1117_v16 }
  0x61   : > { %s1300_s13 = scalar_select %p325_p4, %s1296_s18, 2 }
  0x63   : > { %375 = vmax.xlane.f32.xlu0 %v368_v1  ;;  %s806_s29 = sshll.u32 %s1300_s13, 3 }
  0x64   : > { %s328_s9 = scalar_lea.vmem %s1413_s0, %s806_s29  ;;  %s352_s14 = scalar_lea.vmem %s1416_s3, %s806_s29 }
  0x65   : > { %v1308_v2 = vld [vmem:[%s328_s9] sm:$0xff]  ;;  %v364_v14 = vld [vmem:[%s328_s9 + $0x8] sm:$0xff] }
  0x66   : > { %v370_v25 = vld [vmem:[%s352_s14 + $0x8] sm:$0xff]  ;;  %v369_v26 = vld [vmem:[%s352_s14] sm:$0xff] }
  0x67   : > { %409 = vmax.xlane.f32.xlu0 %v1308_v2 }
  0x6b   : > { %445 = vmax.xlane.f32.xlu0 %v1313_v3 }
  0xe8   : > { %v374_v6 = vpop.xlane.xlu0 %373 }
  0xe9   : > { %vm377_vm0 = vcmp.eq.f32.partialorder %v367_v0, %v374_v6 }
  0xea   : > { %v379_v7 = vsel %vm377_vm0, %v1317_v5, 128 }
  0xeb   : > { %v382_v8 = vshra.s32 %v379_v7, 16  ;;  %v381_v17 = vand.u32 65535, %v379_v7 }
  0xec   : > { %v376_v9 = vpop.xlane.xlu0 %375 }
  0xed   : > { %vm378_vm1 = vcmp.eq.f32.partialorder %v368_v1, %v376_v9  ;;  %v384_v10 = vcvt.s32.f32 %v382_v8  ;;  %v383_v20 = vcvt.s32.f32 %v381_v17 }
  0xee   : > { %v380_v11 = vsel %vm378_vm1, %v1317_v5, 128 }
  0xef   : > { %385 = vmin.xlane.f32.xlu1 %v384_v10  ;;  %v396_v12 = vshra.s32 %v380_v11, 16  ;;  %v395_v18 = vand.u32 65535, %v380_v11 }
  0xf0   : > { %v1333_v28 = vpop.xlane.xlu0 %409 }
  0xf1   : > { %v398_v13 = vcvt.s32.f32 %v396_v12  ;;  %v397_v23 = vcvt.s32.f32 %v395_v18  ;;  %v413_v31 = vsub.f32 %v1308_v2, %v1333_v28 }
  0xf3   : > { %399 = vmin.xlane.f32.xlu1 %v398_v13  ;;  %v415_v33 = vmul.f32 1.442695, %v413_v31 }
  0xf4   : > { %v1338_v32 = vpop.xlane.xlu0 %445 }
  0xf5   : > { %v449_v34 = vsub.f32 %v1313_v3, %v1338_v32 }
  0xf7   : > { %411 = vmax.xlane.f32.xlu1 %v364_v14  ;;  %v451_v36 = vmul.f32 1.442695, %v449_v34 }
  0xfb   : > { %447 = vmax.xlane.f32.xlu1 %v1323_v15 }
 0x178   : > { %v386_v19 = vpop.xlane.xlu1 %385 }
 0x179   : > { %vm387_vm2 = vcmp.eq.f32.partialorder %v384_v10, %v386_v19  ;;  %v392_v45 = vcvt.f32.s32 %v386_v19 }
 0x17a   : > { %v388_v21 = vsel %vm387_vm2, %v383_v20, inf }
 0x17b   : > { %389 = vmin.xlane.f32.xlu0 %v388_v21  ;;  %v393_v49 = vshll.u32 %v392_v45, 16 }
 0x17c   : > { %v400_v22 = vpop.xlane.xlu1 %399 }
 0x17d   : > { %vm401_vm3 = vcmp.eq.f32.partialorder %v398_v13, %v400_v22  ;;  %v406_v50 = vcvt.f32.s32 %v400_v22 }
 0x17e   : > { %v402_v24 = vsel %vm401_vm3, %v397_v23, inf }
 0x17f   : > { %403 = vmin.xlane.f32.xlu1 %v402_v24  ;;  %v407_v55 = vshll.u32 %v406_v50, 16 }
 0x180   : > { %v1331_v27 = vpop.xlane.xlu1 %411 }
 0x181   : > { %v414_v29 = vsub.f32 %v364_v14, %v1331_v27 }
 0x183   : > { %v417_v30 = vmul.f32 1.442695, %v414_v29 }
 0x184   : > { %v1342_v35 = vpop.xlane.xlu1 %447 }
 0x185   : > { %939 = vpow2.f32 %v417_v30  ;;  %v450_v37 = vsub.f32 %v1323_v15, %v1342_v35 }
 0x186   : > { %941 = vpow2.f32 %v415_v33 }
 0x187   : > { %943 = vpow2.f32 %v451_v36  ;;  %v453_v38 = vmul.f32 1.442695, %v450_v37 }
 0x189   : > { %945 = vpow2.f32 %v453_v38 }
 0x190   : > { %433 = vperm.xlu1 %938, %v370_v25  }
 0x191   : > { %430 = vperm.xlu0 %937, %v369_v26  }
 0x192   : > { %v940_v39 = vpop.eup %939 }
 0x193   : > { %v942_v40 = vpop.eup %941 }
 0x194   : > { %v944_v41 = vpop.eup %943 }
 0x196   : > { %v946_v42 = vpop.eup %945 }
 0x1b0   : > { %421 = vadd.xlane.f32.xlu0 %v940_v39 }
 0x1b4   : > { %419 = vadd.xlane.f32.xlu1 %v942_v40 }
 0x1b8   : > { %455 = vadd.xlane.f32.xlu1 %v944_v41 }
 0x1bc   : > { %457 = vadd.xlane.f32.xlu1 %v946_v42 }
 0x204   : > { %v390_v43 = vpop.xlane.xlu0 %389 }
 0x205   : > { %v391_v46 = vcvt.f32.s32 %v390_v43 }
 0x207   : > { %v394_v52 = vadd.s32 %v393_v49, %v391_v46 }
 0x208   : > { %v404_v44 = vpop.xlane.xlu1 %403 }
 0x209   : > { %v405_v53 = vcvt.f32.s32 %v404_v44  ;;  %vm465_vm6 = vcmp.eq.s32.totalorder %v1317_v5, %v394_v52 }
 0x20a   : > { %v467_v57 = vsel %vm465_vm6, %v1313_v3, 0.0 }
 0x20b   : > { %v408_v56 = vadd.s32 %v407_v55, %v405_v53 }
 0x20c   : > { %v431_v47 = vpop.permute.xlu0 %430  ;;  %v434_v48 = vpop.permute.xlu1 %433 }
 0x20d   : > { %vm435_vm4 = vcmp.eq.s32.totalorder %v1317_v5, %v431_v47  ;;  %vm436_vm5 = vcmp.eq.s32.totalorder %v1317_v5, %v434_v48  ;;  %vm466_vm7 = vcmp.eq.s32.totalorder %v1317_v5, %v408_v56 }
 0x20e   : > { %v437_v51 = vsel %vm435_vm4, %v1308_v2, 0.0  ;;  %v438_v54 = vsel %vm436_vm5, %v364_v14, 0.0  ;;  %v468_v58 = vsel %vm466_vm7, %v1323_v15, 0.0 }
 0x20f   : > { %439 = vadd.xlane.f32.xlu1 %v437_v51 }
 0x213   : > { %441 = vadd.xlane.f32.xlu1 %v438_v54 }
 0x217   : > { %469 = vadd.xlane.f32.xlu1 %v467_v57 }
 0x21b   : > { %471 = vadd.xlane.f32.xlu1 %v468_v58 }
 0x239   : > { %v422_v61 = vpop.xlane.xlu0 %421 }
 0x23d   : > { %v420_v59 = vpop.xlane.xlu1 %419 }
 0x23e   : > { %947 = vlog2.f32 %v420_v59 }
 0x241   : > { %v456_v60 = vpop.xlane.xlu1 %455 }
 0x242   : > { %949 = vlog2.f32 %v456_v60 }
 0x243   : > { %951 = vlog2.f32 %v422_v61 }
 0x245   : > { %v458_v62 = vpop.xlane.xlu1 %457 }
 0x246   : > { %953 = vlog2.f32 %v458_v62 }
 0x24b   : > { %v948_v63 = vpop.eup %947 }
 0x24c   : > { %v424_v2 = vmul.f32 0.6931472, %v948_v63 }
 0x24e   : > { %v427_v9 = vadd.f32 %v424_v2, %v1333_v28 }
 0x24f   : > { %v950_v0 = vpop.eup %949 }
 0x250   : > { %v952_v6 = vpop.eup %951  ;;  %v460_v3 = vmul.f32 0.6931472, %v950_v0 }
 0x251   : > { %v426_v5 = vmul.f32 0.6931472, %v952_v6 }
 0x252   : > { %v463_v12 = vadd.f32 %v460_v3, %v1338_v32 }
 0x253   : > { %v954_v7 = vpop.eup %953  ;;  %v428_v14 = vadd.f32 %v426_v5, %v1331_v27 }
 0x254   : > { %v462_v10 = vmul.f32 0.6931472, %v954_v7 }
 0x256   : > { %v464_v19 = vadd.f32 %v462_v10, %v1342_v35 }
 0x298   : > { %v440_v1 = vpop.xlane.xlu1 %439 }
 0x299   : > { %v443_v11 = vsub.f32 %v427_v9, %v440_v1 }
 0x29b   : > { %v475_v16 = vmul.f32 0.5, %v443_v11 }
 0x29c   : > { %v442_v8 = vpop.xlane.xlu1 %441 }
 0x29d   : > { %v444_v17 = vsub.f32 %v428_v14, %v442_v8 }
 0x29f   : > { %v476_v23 = vmul.f32 0.5, %v444_v17 }
 0x2a0   : > { %v470_v13 = vpop.xlane.xlu1 %469 }
 0x2a1   : > { %v473_v15 = vsub.f32 %v463_v12, %v470_v13 }
 0x2a3   : > { %v477_v18 = vmul.f32 0.5, %v473_v15 }
 0x2a4   : > { %v472_v20 = vpop.xlane.xlu1 %471 }
 0x2a5   : > { %v479_v21 = vadd.f32 %v477_v18, %v475_v16  ;;  %v474_v22 = vsub.f32 %v464_v19, %v472_v20  ;;  %484 = sbr.rel (%p1422_p7) target bundleno = 684 (0x2ac), region = 48 }
 0x2a7   : > { %v478_v24 = vmul.f32 0.5, %v474_v22 }
 0x2a9   : > { %v480_v25 = vadd.f32 %v478_v24, %v476_v23 }
 0x2aa   : > { %vm485_vm8 = vcmask 7168  }
 0x2ab   : > { %486 = vst.msk [vmem:[%s1358_s15] sm:$0xff] %vm485_vm8, %v479_v21  ;;  %487 = vst.msk [vmem:[%s1358_s15 + $0x8] sm:$0xff] %vm485_vm8, %v480_v25 }
 0x2ac PF: > { %p810_p5 = scmp.ne.s32.totalorder %s1162_s19, 1 }
 0x2ad   : > { %s811_s21 = sshll.u32 (!%p810_p5), %s1162_s19, 4 }
 0x2ae   : > { %491 = sbr.rel (%p810_p5) target bundleno = 700 (0x2bc), region = 52 }
 0x2b3   : > { %v494_v26 = vshrl.u32 %v371_v4, 7  ;;  %v496_v27 = vstv %s811_s21  ;;  %vm503_vm9 = vcmask 7168  }
 0x2b5   : > { %v497_v28 = vadd.s32 %v496_v27, %v494_v26  ;;  %v495_v29 = vadd.s32 8, %v494_v26 }
 0x2b7   : > { %vm499_vm10 = vcmp.lt.s32.totalorder %v497_v28, 20  ;;  %v498_v30 = vadd.s32 %v496_v27, %v495_v29 }
 0x2b8   : > { %v501_v31 = vsel %vm499_vm10, %v479_v21, 0.0 }
 0x2b9   : > { %504 = vst.msk [vmem:[%s1358_s15] sm:$0xff] %vm503_vm9, %v501_v31  ;;  %vm500_vm11 = vcmp.lt.s32.totalorder %v498_v30, 20 }
 0x2ba   : > { %v502_v32 = vsel %vm500_vm11, %v480_v25, 0.0 }
 0x2bb   : > { %505 = vst.msk [vmem:[%s1358_s15 + $0x8] sm:$0xff] %vm503_vm9, %v502_v32 }
 0x2bc PF: > { %p1423_p9 = scmp.ne.s32.totalorder %s1421_s26, 0 }
 0x2bd   : > { %s514_s27 = ssub.s32 (%p1423_p9), 3, %s1296_s18  ;;  %s831_s5 = sshll.u32 (%p1423_p9), %s1162_s19, 4 }
 0x2be   : > { %512 = sbr.rel (!%p1423_p9) target bundleno = 746 (0x2ea), region = 56  ;;  %p515_p10 = scmp.lt.s32.totalorder (%p1423_p9), %s514_s27, 2 }
 0x2bf   : > { %s1376_s12 = scalar_lea.vmem (%p1423_p9), %s1417_s4, %s831_s5  }
 0x2c3   : > { %s1433_s27 = smov (!%p515_p10, %s514_s27), 2 }
 0x2c4   : > { %s814_s30 = sshll.u32 %s1433_s27, 7 }
 0x2c5   : > { %p817_p12 = scmp.eq.s32.totalorder %s814_s30, 0 }
 0x2c6   : > { %s1382_s6 = sshrl.u32 (!%p817_p12), %s1433_s27, 1 }
 0x2c7   : > { %523 = sbr.rel (%p817_p12) target bundleno = 746 (0x2ea), region = 60  ;;  %p818_p13 = scmp.le.s32.totalorder (!%p817_p12), %s1382_s6, 0 }
 0x2cc   : > { %716 = sbr.rel (%p818_p13) target bundleno = 729 (0x2d9), region = 157  ;;  %s1079_s19 = smov (!%p818_p13), %s1376_s12  }
 0x2cd   : > { %s1083_s26 = smov (!%p818_p13), %s1358_s15   ;;  %s1087_s22 = smov (!%p818_p13), 0  }
 0x2ce   : > { %s1091_s28 = smov (!%p818_p13), 0  }
 0x2d1 LB: >> { %v588_v4 = vld [vmem:[%s1085_s26] sm:$0xff]  ;;  %v590_v33 = vld [vmem:[%s1085_s26 + $0x8] sm:$0xff]  ;;  %s592_s18 = sadd.s32 1, %s1089_s22  ;;  %s582_s28 = sadd.s32 1, %s1093_s28   ;;  %s1093_s28 = sphi %s1091_s28, %s582_s28   ;;  %s1089_s22 = sphi %s1087_s22, %s1088_s22   ;;  %s1085_s26 = sphi %s1083_s26, %s597_s26   ;;  %s1081_s19 = sphi %s1079_s19, %s598_s19  }
 0x2d2   : >> { %589 = vst [vmem:[%s1081_s19] sm:$0xff] %v588_v4  ;;  %591 = vst [vmem:[%s1081_s19 + $0x8] sm:$0xff] %v590_v33  ;;  %p593_p1 = scmp.ge.s32.totalorder %s592_s18, %s1382_s6  ;;  %p581_p6 = scmp.ge.s32.totalorder %s582_s28, %s1382_s6 }
 0x2d4   : >> { %s1435_s18 = smov (%p593_p1, %s592_s18), 0  ;;  %584 = sbr.rel (!%p581_p6) target bundleno = 721 (0x2d1), region = 163 }
 0x2d5   : >> { %s819_s13 = sshll.u32 %s1435_s18, 4  ;;  %s1088_s22 = smov %s1435_s18  }
 0x2d6   : >> { %s597_s26 = scalar_lea.vmem %s1358_s15, %s819_s13 [#allocation6]   ;;  %s598_s19 = scalar_lea.vmem %s1376_s12, %s819_s13  }
 0x2d9 PF: > { %s1392_s29 = sand.u32 1, %s1433_s27   ;;  %s832_s8 = sshll.u32 %s1382_s6, 4 }
 0x2da   : > { %s603_s25 = scalar_lea.vmem %s1358_s15, %s832_s8 [#allocation6]   ;;  %s605_s9 = scalar_lea.vmem %s1376_s12, %s832_s8  }
 0x2db   : > { %p824_p8 = scmp.le.s32.totalorder %s1392_s29, 0 }
 0x2dc   : > { %s1095_s10 = smov (!%p824_p8), %s605_s9   ;;  %s1099_s11 = smov (!%p824_p8), %s603_s25  }
 0x2dd   : > { %730 = sbr.rel (%p824_p8) target bundleno = 746 (0x2ea), region = 168  ;;  %s1103_s14 = smov (!%p824_p8), 0  }
 0x2de   : > { %s1107_s21 = smov (!%p824_p8), 0  }
 0x2e2 LB: >> { %v615_v34 = vld [vmem:[%s1101_s11] sm:$0xff]  ;;  %s617_s27 = sadd.s32 1, %s1105_s14  ;;  %s609_s21 = sadd.s32 1, %s1109_s21   ;;  %s1109_s21 = sphi %s1107_s21, %s609_s21   ;;  %s1105_s14 = sphi %s1103_s14, %s1104_s14   ;;  %s1101_s11 = sphi %s1099_s11, %s622_s11   ;;  %s1097_s10 = sphi %s1095_s10, %s623_s10  }
 0x2e3   : >> { %616 = vst [vmem:[%s1097_s10] sm:$0xff] %v615_v34  ;;  %p618_p11 = scmp.ge.s32.totalorder %s617_s27, %s1392_s29  ;;  %p608_p0 = scmp.ge.s32.totalorder %s609_s21, %s1392_s29 }
 0x2e5   : >> { %s1437_s27 = smov (%p618_p11, %s617_s27), 0  ;;  %611 = sbr.rel (!%p608_p0) target bundleno = 738 (0x2e2), region = 174 }
 0x2e6   : >> { %s825_s15 = sshll.u32 %s1437_s27, 3  ;;  %s1104_s14 = smov %s1437_s27  }
 0x2e7   : >> { %s622_s11 = scalar_lea.vmem %s603_s25, %s825_s15 [#allocation6]   ;;  %s623_s10 = scalar_lea.vmem %s605_s9, %s825_s15  }
 0x2ea PF: > { %p17_p2 = scmp.ge.s32.totalorder %s1165_s20, 4   ;;  %s1424_s15 = smov %s1069_s16 }
 0x2eb   : > { %s1425_s16 = smov %s1073_s17  ;;  %s1426_s17 = smov %s1175_s23 }
 0x2ec   : > { %s1427_s18 = smov %s1165_s20  ;;  %19 = sbr.rel (!%p17_p2) target bundleno = 5 (0x5), region = 185 }
 0x2f1   :  { %639 = vsyncpa [#allocation3], 1 }
 0x2f2   :  { %641 = vsyncpa [#allocation3 + $0x1], 1 }
 0x2f3   :  { %642 = vsyncpa [#allocation5], 1 }
 0x2f4   :  { %644 = vsyncpa [#allocation5 + $0x1], 1 }

</bundles_post_ra>
